<compile_context>
chip_gen: v6e
topology: v6e:2x2x1
jax: 0.10.0
libtpu: 0.0.40
codegen_flags: <defaults>
</compile_context>

<pallas_src>
import functools

import jax
import jax.numpy as jnp
from jax import lax
from jax.experimental import pallas as pl
from jax.experimental.pallas import tpu as pltpu


def _round_up(x: int, m: int) -> int:
    return (x + m - 1) // m * m


def _hash_bits_u32(shape, seed_i32, base_i32):
    """Counter-based per-element uint32 hash (lowbias32 finalizer).

    Pure elementwise integer ops -> lowers on Mosaic VPU and in interpret
    mode (unlike the stateful pltpu.prng_* primitives).
    """
    T, D = shape
    r = lax.broadcasted_iota(jnp.int32, shape, 0)
    c = lax.broadcasted_iota(jnp.int32, shape, 1)
    ctr = (base_i32 + r) * jnp.int32(D) + c            # global element index
    x = ctr.astype(jnp.uint32) ^ (seed_i32.astype(jnp.uint32) * jnp.uint32(0x9E3779B9))
    x = x ^ (x >> 16)
    x = x * jnp.uint32(0x7FEB352D)
    x = x ^ (x >> 15)
    x = x * jnp.uint32(0x846CA68B)
    x = x ^ (x >> 16)
    return x


# ----------------------------- kernel ----------------------------------------

def _emb_kernel(ids_ref, seed_ref, table_ref, out_ref, *, training: bool):
    # ids_ref  : (Np,)  int32, SMEM (scalar prefetch)
    # seed_ref : (1,)   int32, SMEM (scalar prefetch)
    # table_ref: (V, D) f32,   VMEM-resident embedding table
    # out_ref  : (T, D) f32,   VMEM output tile
    i = pl.program_id(0)
    T, D = out_ref.shape

    # Gather T embedding rows (exact copies) into the output tile.
    def gather_row(t, carry):
        idx = ids_ref[i * T + t]
        out_ref[pl.ds(t, 1), :] = table_ref[pl.ds(idx, 1), :]
        return carry

    lax.fori_loop(0, T, gather_row, 0)

    tile = jnp.maximum(out_ref[...], jnp.float32(0.0))          # ReLU

    if training:
        # Inverted dropout, p = 0.5: keep prob 0.5, scale kept values by 2.
        bits = _hash_bits_u32((T, D), seed_ref[0], i * T)
        keep = bits < jnp.uint32(0x80000000)                    # Bernoulli(0.5)
        tile = jnp.where(keep, tile * jnp.float32(2.0), jnp.float32(0.0))

    out_ref[...] = tile


# ----------------------------- wrapper ----------------------------------------

def embedding_forward(x, emb_table, *, seed: int = 0, training: bool = False,
                      tokens_per_tile: int = 512):
    """x: (B, S) int token ids; emb_table: (V, D) float32. Returns (B, S, D)."""
    B, S = x.shape
    V, D = emb_table.shape
    N = B * S

    # Tile of T tokens per grid step; T multiple of 8 so the (T, D) output
    # block satisfies the (8, 128) tiling and stores are unmasked.
    T = min(_round_up(tokens_per_tile, 8), _round_up(N, 8))
    Np = _round_up(N, T)

    ids = jnp.zeros((Np,), jnp.int32).at[:N].set(x.reshape(N).astype(jnp.int32))
    seed_arr = jnp.array([seed], dtype=jnp.int32)

    kernel = functools.partial(_emb_kernel, training=training)

    table_bytes = V * D * emb_table.dtype.itemsize
    tile_bytes = T * D * 4
    vmem_limit = int(min(64 << 20, max(16 << 20, 2 * (table_bytes + 2 * tile_bytes))))

    out = pl.pallas_call(
        kernel,
        out_shape=jax.ShapeDtypeStruct((Np, D), jnp.float32),
        grid_spec=pltpu.PrefetchScalarGridSpec(
            num_scalar_prefetch=2,                       # ids, seed -> SMEM
            grid=(Np // T,),
            in_specs=[
                # Whole embedding table resident in VMEM for the entire call.
                # TODO(synk): for very large vocabularies (table >~32 MiB on
                # v7x) switch to memory_space=pl.ANY + per-row async-copy gather.
                pl.BlockSpec(memory_space=pltpu.MemorySpace.VMEM),
            ],
            out_specs=pl.BlockSpec((T, D), lambda i, ids, seed: (i, 0)),
        ),
        compiler_params=pltpu.CompilerParams(
            dimension_semantics=("parallel",),           # megacore on v7x
            vmem_limit_bytes=vmem_limit,
        ),
        cost_estimate=pl.CostEstimate(
            flops=2 * Np * D,
            transcendentals=0,
            bytes_accessed=table_bytes + Np * 4 + Np * D * 4,
        ),
    )(ids, seed_arr, emb_table)

    return out[:N].reshape(B, S, D)


# ----------------------------- demo / check ----------------------------------

if __name__ == "__main__":
    key = jax.random.PRNGKey(0)
    k_emb, k_ids = jax.random.split(key)

    # Small, deterministic synthetic setup consistent with the module:
    # len(word_map) = V vocabulary entries, emb_dim = D; token ids (B, S).
    V, D = 64, 128
    B, S = 2, 8

    emb_table = jax.random.normal(k_emb, (V, D), dtype=jnp.float32)
    x = jax.random.randint(k_ids, (B, S), 0, V, dtype=jnp.int32)

    # Eval mode (dropout = identity): deterministic, check against JAX reference.
    out_eval = jax.block_until_ready(
        embedding_forward(x, emb_table, seed=0, training=False))
    ref = jnp.maximum(emb_table[x], 0.0)
    assert out_eval.shape == (B, S, D)
    assert jnp.allclose(out_eval, ref, atol=1e-6), "eval-mode mismatch vs reference"

    # Training mode (stochastic dropout, p=0.5, inverted scaling).
    out_train = jax.block_until_ready(
        embedding_forward(x, emb_table, seed=1234, training=True))
    relu2 = 2.0 * ref
    ok = jnp.all((jnp.abs(out_train) < 1e-6) | (jnp.abs(out_train - relu2) < 1e-5))
    assert bool(ok), "training-mode dropout produced unexpected values"
    pos = ref > 0
    keep_frac = jnp.sum((out_train > 0) & pos) / jnp.maximum(jnp.sum(pos), 1)
    assert 0.2 < float(keep_frac) < 0.8, "dropout keep-rate far from 0.5"

    print("KERNEL_OK")
</pallas_src>

<mosaic_0001>
module attributes {stable_mosaic.version = 11 : i64} {
  func.func @_emb_kernel(%arg0: i32, %arg1: memref<16xi32, #tpu.memory_space<smem>>, %arg2: memref<1xi32, #tpu.memory_space<smem>>, %arg3: memref<64x128xf32, #tpu.memory_space<vmem>>, %arg4: memref<16x128xf32, #tpu.memory_space<vmem>>) attributes {dimension_semantics = [#tpu.dimension_semantics<parallel>], iteration_bounds = array<i64: 1>, scalar_prefetch = 2 : i64, scratch_operands = 0 : i64, tpu.core_type = #tpu.core_type<tc>, window_params = [{pipeline_mode = #tpu.pipeline_mode<synchronous>, transform_indices = @transform_0, window_bounds = array<i64: 64, 128>}, {transform_indices = @transform_1, window_bounds = array<i64: 16, 128>}]} {
    %c0_i32 = arith.constant 0 : i32
    %c16_i32 = arith.constant 16 : i32
    %0 = arith.addi %c0_i32, %c16_i32 : i32
    %c1_i32 = arith.constant 1 : i32
    scf.for %arg5 = %c0_i32 to %0 step %c1_i32  : i32 {
      %c16_i32_4 = arith.constant 16 : i32
      %5 = arith.muli %arg0, %c16_i32_4 : i32
      %6 = arith.addi %5, %arg5 : i32
      %7 = arith.index_cast %6 : i32 to index
      %8 = memref.load %arg1[%7] : memref<16xi32, #tpu.memory_space<smem>>
      %9 = arith.index_cast %8 : i32 to index
      %c0_5 = arith.constant 0 : index
      %10 = vector.load %arg3[%9, %c0_5] : memref<64x128xf32, #tpu.memory_space<vmem>>, vector<1x128xf32>
      %11 = arith.index_cast %arg5 : i32 to index
      %c0_6 = arith.constant 0 : index
      %12 = vector.load %arg4[%11, %c0_6] : memref<16x128xf32, #tpu.memory_space<vmem>>, vector<1x128xf32>
      tpu.vector_store %arg4[%11, %c0_6], %10 {strides = array<i32>} : memref<16x128xf32, #tpu.memory_space<vmem>>, vector<1x128xf32>,
    }
    %c16_i32_0 = arith.constant 16 : i32
    %c0 = arith.constant 0 : index
    %c0_1 = arith.constant 0 : index
    %1 = vector.load %arg4[%c0, %c0_1] : memref<16x128xf32, #tpu.memory_space<vmem>>, vector<16x128xf32>
    %cst = arith.constant 0.000000e+00 : f32
    %2 = vector.broadcast %cst : f32 to vector<16x128xf32>
    %3 = arith.maximumf %1, %2 : vector<16x128xf32>
    %c0_2 = arith.constant 0 : index
    %c0_3 = arith.constant 0 : index
    %4 = vector.load %arg4[%c0_2, %c0_3] : memref<16x128xf32, #tpu.memory_space<vmem>>, vector<16x128xf32>
    tpu.vector_store %arg4[%c0_2, %c0_3], %3 {strides = array<i32>} : memref<16x128xf32, #tpu.memory_space<vmem>>, vector<16x128xf32>,
    return
  }
  func.func @transform_0(%arg0: i32, %arg1: memref<16xi32, #tpu.memory_space<smem>>, %arg2: memref<1xi32, #tpu.memory_space<smem>>) -> (i32, i32) {
    %c0_i32 = arith.constant 0 : i32
    %c0_i32_0 = arith.constant 0 : i32
    %c0_i32_1 = arith.constant 0 : i32
    return %c0_i32, %c0_i32_0 : i32, i32
  }
  func.func @transform_1(%arg0: i32, %arg1: memref<16xi32, #tpu.memory_space<smem>>, %arg2: memref<1xi32, #tpu.memory_space<smem>>) -> (i32, i32) {
    %c0_i32 = arith.constant 0 : i32
    %c0_i32_0 = arith.constant 0 : i32
    return %arg0, %c0_i32 : i32, i32
  }
}

</mosaic_0001>

<bundles_post_ra>
// kernel: tpu_custom_call.1
= control target key start
LH: loop header
LB: loop body
LE: loop exit
PB: predicated region body
PF: predicated region fallthrough
CT: control target
= control target key end

     0   :  { %s194_s0 = inlined_call_operand.vmem [shape: s32[16], index: 0, kind: input, shape index: {}]   ;;  %s195_s1 = inlined_call_operand.<no memory space> [shape: s32[1], index: 1, kind: input, shape index: {}]   ;;  %s196_s2 = inlined_call_operand.hbm [shape: f32[64,128], index: 2, kind: input, shape index: {}]   ;;  %s197_s3 = inlined_call_operand.hbm [shape: f32[16,128], index: 3, kind: output, shape index: {}]  }
   0x1   :  { %s8_s14 = sshll.u32 %s194_s0, 4  ;;  %s9_s14 = int_to_ptr.vmem [resolvable:$true] %s8_s14 }
   0x2   :  { %s88_s15 = scalar_lea.vmem %s9_s14, 16  ;;  %p93_p1 = scmp.lt.s32.totalorder %s9_s14, %s9_s14 }
   0x3   :  { %p89_p0 = scmp.ne.s32.totalorder %s9_s14, %s88_s15  ;;  %p94_p2 = scmp.lt.s32.totalorder %s88_s15, %s88_s15 }
   0x5   :  { %p95_p3 = por %p94_p2, %p93_p1 }
   0x7   :  { %p96_p4 = pnand %p95_p3, %p89_p0 }
   0x9   :  { %99 = shalt.err (!%p96_p4)  }
   0xa   :  { %s154_s16 = smov [#allocation3]  }
   0xb   :  { %11 = dma.vmem_to_smem %s9_s14, 16, %s154_s16, [#allocation2] }
   0xc   :  { %144 = dma.done.wait [#allocation2], 16 }
   0xd   :  { %145 = vsyncadd [#allocation2], 4294967280 }
   0xe   :  { %14 = sfence }
   0xf   :  { %15 = vsyncpa [#allocation6], 0 }
  0x10   :  { %16 = vsyncpa [#allocation7], 0  ;;  %s155_s1 = smov [#allocation5]  }
  0x11   :  { %s22_s17 = sshll.u32 %s155_s1, 4  ;;  %s23_s17 = int_to_ptr.vmem [resolvable:$true] %s22_s17 }
  0x12   :  { %s108_s18 = scalar_lea.vmem %s23_s17, 1024  ;;  %p113_p6 = scmp.lt.s32.totalorder %s23_s17, %s23_s17 }
  0x13   :  { %p109_p5 = scmp.ne.s32.totalorder %s23_s17, %s108_s18  ;;  %p114_p7 = scmp.lt.s32.totalorder %s108_s18, %s108_s18 }
  0x15   :  { %p115_p8 = por %p114_p7, %p113_p6 }
  0x17   :  { %p116_p9 = pnand %p115_p8, %p109_p5 }
  0x19   :  { %119 = shalt.err (!%p116_p9)
}
  0x1a   :  { %s156_s0 = smov 128   ;;  %s157_s19 = smov 8  }
  0x1b   :  { %28 = dma.hbm_to_vmem [thread:$0]  %s196_s2, 1024, %s23_s17, [#allocation6], %s156_s0, %s156_s0, %s157_s19  }
  0x1c   :  { %146 = dma.done.wait [#allocation6], 1024  }
  0x1d   :  { %147 = vsyncadd [#allocation6], 4294966272  ;;  %s150_s22 = smov 0  }
  0x1e LB: > { %s40_s23 = sld [smem:[#allocation3 + %s152_s22]]  ;;  %s43_s25 = scalar_lea.vmem [#allocation8], %s152_s22  ;;  %s152_s22 = sphi %s150_s22, %s37_s22  }
  0x1f   : > { %s37_s22 = sadd.s32 1, %s152_s22  }
  0x20   : > { %p34_p10 = scmp.ge.s32.totalorder %s37_s22, 16  }
  0x21   :  { %s158_s2 = smov (%p34_p10), [#allocation8]  }
  0x22   :  { %36 = sbr.rel (!%p34_p10) target bundleno = 30 (0x1e), region = 37  ;;  %s56_s26 = sshll.u32 (%p34_p10), %s158_s2, 4  ;;  %s57_s26 = int_to_ptr.vmem [resolvable:$true] %s56_s26 }
  0x23   :  { %s120_s27 = scalar_lea.vmem (%p34_p10), %s57_s26, 256  ;;  %p125_p12 = scmp.lt.s32.totalorder (%p34_p10), %s57_s26, %s57_s26 }
  0x24   : > { %s41_s24 = scalar_lea.vmem [#allocation5], %s40_s23  ;;  %p121_p11 = scmp.ne.s32.totalorder (%p34_p10), %s57_s26, %s120_s27 }
  0x25   : > { %v42_v0 = vld [vmem:[%s41_s24] sm:$0x1]  ;;  %p126_p13 = scmp.lt.s32.totalorder (%p34_p10), %s120_s27, %s120_s27 }
  0x26   : > { %44 = vst [vmem:[%s43_s25] sm:$0x1] %v42_v0 }
  0x27   :  { %p127_p0 = por %p126_p13, %p125_p12 }
  0x29   :  { %p128_p1 = pnand %p127_p0, %p121_p11 }
  0x2d   :  { %v45_v1 = vld [vmem:[#allocation8] sm:$0xff]  ;;  %v46_v2 = vld [vmem:[#allocation8 + $0x8] sm:$0xff] }
  0x2e   :  { %v47_v3 = vmax.f32 %v45_v1, 0.0  ;;  %v48_v4 = vmax.f32 %v46_v2, 0.0 }
  0x30   :  { %49 = vst [vmem:[#allocation8] sm:$0xff] %v47_v3  ;;  %50 = vst [vmem:[#allocation8 + $0x8] sm:$0xff] %v48_v4 }
  0x31   :  { %131 = shalt.err (!%p128_p1)
}
  0x32   :  { %62 = dma.vmem_to_hbm [thread:$0]  %s57_s26, 256, %s197_s3, [#allocation7], %s156_s0, %s156_s0, %s157_s19  }
  0x33   :  { %148 = dma.done.wait [#allocation7], 256  }
  0x34   :  { %149 = vsyncadd [#allocation7], 4294967040 }
  0x35   :  { %66 = vsyncpa [#allocation6], 1 }
  0x36   :  { %67 = vsyncpa [#allocation7], 1 }

</bundles_post_ra>
